<compile_context>
chip_gen: v7x
topology: tpu7x:2x2x1
jax: 0.10.0
libtpu: 0.0.40
codegen_flags: <defaults>
</compile_context>

<pallas_src>
import functools

import numpy as np
import jax
import jax.numpy as jnp
from jax.experimental import pallas as pl
from jax.experimental.pallas import tpu as pltpu


# ---------------------------------------------------------------------------
# Fused single-pass kernel (whole activation resident in VMEM)
# ---------------------------------------------------------------------------

def _se_fused_kernel(hw_inv, x_ref, w1_ref, w2_ref, o_ref):
    """sum -> mean -> FC -> ReLU -> FC -> Hsigmoid -> rescale, one HBM pass."""
    x = x_ref[...]                                           # (N, C, HW)
    mean = jnp.sum(x, axis=2) * hw_inv                       # (N, C)  XLU reduce
    h = jnp.maximum(
        jnp.dot(mean, w1_ref[...], preferred_element_type=jnp.float32), 0.0)
    s = jnp.dot(h, w2_ref[...], preferred_element_type=jnp.float32)
    scale = jnp.clip(s + 3.0, 0.0, 6.0) * (1.0 / 6.0)        # Hsigmoid
    o_ref[...] = x * scale[:, :, None]                       # lane-broadcast mul


# ---------------------------------------------------------------------------
# Two-pass (tiled) kernels for large activations
# ---------------------------------------------------------------------------

def _se_scale_kernel(hw_inv, x_ref, w1_ref, w2_ref, y_ref, acc_ref):
    """Tiled spatial-sum reduction + fused FC/ReLU/FC/Hsigmoid epilogue.

    x_ref:  (N, C, TILE_S) tile of the activation (spatial on lanes)
    w1_ref: (C, C//r)  first Linear weight (input-major)
    w2_ref: (C//r, C)  second Linear weight
    y_ref:  (N, C)     per-(batch, channel) SE scale (resident output)
    acc_ref:(N, C)     f32 partial-sum scratch (resident across the grid)
    """
    t = pl.program_id(0)

    @pl.when(t == 0)
    def _():
        acc_ref[...] = jnp.zeros_like(acc_ref)

    # Partial spatial sum of this tile (cross-lane reduce -> XLU slot).
    acc_ref[...] += jnp.sum(x_ref[...], axis=2)

    @pl.when(t == pl.num_programs(0) - 1)
    def _():
        mean = acc_ref[...] * hw_inv                                   # (N, C)
        h = jnp.maximum(
            jnp.dot(mean, w1_ref[...], preferred_element_type=jnp.float32),
            0.0)                                                       # ReLU
        s = jnp.dot(h, w2_ref[...], preferred_element_type=jnp.float32)
        y_ref[...] = jnp.clip(s + 3.0, 0.0, 6.0) * (1.0 / 6.0)         # Hsigmoid


def _se_apply_kernel(x_ref, y_ref, o_ref):
    """out = x * scale, scale broadcast over the spatial (lane) axis."""
    o_ref[...] = x_ref[...] * y_ref[...][:, :, None]


# ---------------------------------------------------------------------------
# Wrapper
# ---------------------------------------------------------------------------

_FUSED_VMEM_BUDGET = 8 << 20       # x + out single-buffered, leave headroom
_TILE_BYTES_BUDGET = 2 << 20       # per-block budget for the tiled fallback


def _choose_spatial_tile(hw, n, c, budget_bytes=_TILE_BYTES_BUDGET):
    """Largest lane-aligned (multiple of 128) divisor of hw within budget."""
    if hw % 128 == 0:
        best = None
        t = 128
        while t <= hw:
            if hw % t == 0 and n * c * t * 4 <= budget_bytes:
                best = t
            t += 128
        return best if best is not None else 128
    # Odd spatial extents: fall back to the full (untiled) spatial axis.
    # TODO(synk): pad the spatial axis to a multiple of 128 for very large,
    # non-aligned activations instead of taking one full-width tile.
    return hw


def se_module(x_nchw, w1, w2, *, force_two_pass=False):
    """SEModule forward.  x_nchw: (N, C, H, W) f32.  Returns (N, C, H, W)."""
    N, C, H, W = x_nchw.shape
    HW = H * W
    Cr = w1.shape[1]
    assert w1.shape == (C, Cr) and w2.shape == (Cr, C)

    x = x_nchw.reshape(N, C, HW)                       # free: contiguous view
    x_bytes = N * C * HW * 4
    w_bytes = 2 * C * Cr * 4

    # ---- fast path: everything fits in VMEM -> one HBM read + one write ----
    if not force_two_pass and (2 * x_bytes + w_bytes) <= _FUSED_VMEM_BUDGET:
        out = pl.pallas_call(
            functools.partial(_se_fused_kernel, 1.0 / HW),
            out_shape=jax.ShapeDtypeStruct((N, C, HW), jnp.float32),
        )(x, w1, w2)
        return out.reshape(N, C, H, W)

    # ---- fallback: two tiled passes over the activation ---------------------
    tile = _choose_spatial_tile(HW, N, C)
    num_tiles = HW // tile

    # Pass 1: per-(batch, channel) SE scale (reduction + fused FC epilogue).
    y = pl.pallas_call(
        functools.partial(_se_scale_kernel, 1.0 / HW),
        grid=(num_tiles,),
        in_specs=[
            pl.BlockSpec((N, C, tile), lambda t: (0, 0, t)),
            pl.BlockSpec((C, Cr), lambda t: (0, 0)),      # resident weights
            pl.BlockSpec((Cr, C), lambda t: (0, 0)),
        ],
        out_specs=pl.BlockSpec((N, C), lambda t: (0, 0)),  # resident output
        out_shape=jax.ShapeDtypeStruct((N, C), jnp.float32),
        scratch_shapes=[pltpu.VMEM((N, C), jnp.float32)],
        compiler_params=pltpu.CompilerParams(
            dimension_semantics=("arbitrary",)),           # reduction axis
    )(x, w1, w2)

    # Pass 2: rescale the activation (tiled, double-buffered, parallel).
    out = pl.pallas_call(
        _se_apply_kernel,
        grid=(num_tiles,),
        in_specs=[
            pl.BlockSpec((N, C, tile), lambda t: (0, 0, t)),
            pl.BlockSpec((N, C), lambda t: (0, 0)),        # resident scale
        ],
        out_specs=pl.BlockSpec((N, C, tile), lambda t: (0, 0, t)),
        out_shape=jax.ShapeDtypeStruct((N, C, HW), jnp.float32),
        compiler_params=pltpu.CompilerParams(
            dimension_semantics=("parallel",)),            # megacore sharding
    )(x, y)

    return out.reshape(N, C, H, W)


# ---------------------------------------------------------------------------
# Self-test
# ---------------------------------------------------------------------------

if __name__ == "__main__":
    key = jax.random.PRNGKey(0)
    kx, k1, k2 = jax.random.split(key, 3)

    # Small shapes consistent with SEModule: batch=2, channel=128
    # (reduction=4 -> hidden 32), 16x16 spatial.
    N, C, H, W = 2, 128, 16, 16
    reduction = 4
    Cr = C // reduction

    x = jax.random.normal(kx, (N, C, H, W), dtype=jnp.float32)
    # Linear weights stored input-major (PyTorch stores (out, in); transposed).
    w1 = (1.0 / np.sqrt(C)) * jax.random.normal(k1, (C, Cr), dtype=jnp.float32)
    w2 = (1.0 / np.sqrt(Cr)) * jax.random.normal(k2, (Cr, C), dtype=jnp.float32)

    # Pure-JAX reference (matches SEModule.forward semantics).
    y_ref = jnp.mean(x, axis=(2, 3))                       # AdaptiveAvgPool2d(1)
    h_ref = jnp.maximum(y_ref @ w1, 0.0)                   # Linear + ReLU
    s_ref = jnp.clip(h_ref @ w2 + 3.0, 0.0, 6.0) / 6.0     # Linear + Hsigmoid
    ref = x * s_ref[:, :, None, None]

    # Exercise both the fused fast path and the tiled two-pass fallback.
    out_fused = jax.block_until_ready(se_module(x, w1, w2))
    out_tiled = jax.block_until_ready(se_module(x, w1, w2, force_two_pass=True))

    for out in (out_fused, out_tiled):
        assert out.shape == (N, C, H, W), out.shape
        assert bool(jnp.all(jnp.isfinite(out)))
        assert bool(jnp.allclose(out, ref, atol=1e-5, rtol=1e-5))

    print("KERNEL_OK")
</pallas_src>

<mosaic_0001>
module attributes {stable_mosaic.version = 11 : i64} {
  func.func @_se_fused_kernel(%arg0: memref<2x128x256xf32, #tpu.memory_space<vmem>>, %arg1: memref<128x32xf32, #tpu.memory_space<vmem>>, %arg2: memref<32x128xf32, #tpu.memory_space<vmem>>, %arg3: memref<2x128x256xf32, #tpu.memory_space<vmem>>) attributes {dimension_semantics = [], scalar_prefetch = 0 : i64, scratch_operands = 0 : i64, tpu.core_type = #tpu.core_type<tc>} {
    %c0 = arith.constant 0 : index
    %c0_0 = arith.constant 0 : index
    %c0_1 = arith.constant 0 : index
    %0 = vector.load %arg0[%c0, %c0_0, %c0_1] : memref<2x128x256xf32, #tpu.memory_space<vmem>>, vector<2x128x256xf32>
    %cst = arith.constant dense<0.000000e+00> : vector<2x128xf32>
    %1 = vector.multi_reduction <add>, %0, %cst [2] : vector<2x128x256xf32> to vector<2x128xf32>
    %cst_2 = arith.constant 3.906250e-03 : f32
    %2 = vector.broadcast %cst_2 : f32 to vector<2x128xf32>
    %3 = arith.mulf %1, %2 : vector<2x128xf32>
    %c0_3 = arith.constant 0 : index
    %c0_4 = arith.constant 0 : index
    %4 = vector.load %arg1[%c0_3, %c0_4] : memref<128x32xf32, #tpu.memory_space<vmem>>, vector<128x32xf32>
    %cst_5 = arith.constant dense<0.000000e+00> : vector<2x32xf32>
    %5 = tpu.matmul %3, %4, %cst_5 {dimension_numbers = #tpu.dot_dimension_numbers<[1], [0], [0], [1], [0, 0, 1, 1], [], []>} : vector<2x128xf32>, vector<128x32xf32>, vector<2x32xf32> -> vector<2x32xf32>
    %cst_6 = arith.constant 0.000000e+00 : f32
    %6 = vector.broadcast %cst_6 : f32 to vector<2x32xf32>
    %7 = arith.maximumf %5, %6 : vector<2x32xf32>
    %c0_7 = arith.constant 0 : index
    %c0_8 = arith.constant 0 : index
    %8 = vector.load %arg2[%c0_7, %c0_8] : memref<32x128xf32, #tpu.memory_space<vmem>>, vector<32x128xf32>
    %cst_9 = arith.constant dense<0.000000e+00> : vector<2x128xf32>
    %9 = tpu.matmul %7, %8, %cst_9 {dimension_numbers = #tpu.dot_dimension_numbers<[1], [0], [0], [1], [0, 0, 1, 1], [], []>} : vector<2x32xf32>, vector<32x128xf32>, vector<2x128xf32> -> vector<2x128xf32>
    %cst_10 = arith.constant 3.000000e+00 : f32
    %10 = vector.broadcast %cst_10 : f32 to vector<2x128xf32>
    %11 = arith.addf %9, %10 : vector<2x128xf32>
    %cst_11 = arith.constant 0.000000e+00 : f32
    %cst_12 = arith.constant 6.000000e+00 : f32
    %12 = vector.broadcast %cst_11 : f32 to vector<2x128xf32>
    %13 = arith.maximumf %12, %11 : vector<2x128xf32>
    %14 = vector.broadcast %cst_12 : f32 to vector<2x128xf32>
    %15 = arith.minimumf %14, %13 : vector<2x128xf32>
    %cst_13 = arith.constant 0.166666672 : f32
    %16 = vector.broadcast %cst_13 : f32 to vector<2x128xf32>
    %17 = arith.mulf %15, %16 : vector<2x128xf32>
    %18 = vector.shape_cast %17 : vector<2x128xf32> to vector<2x128x1xf32>
    %19 = vector.broadcast %18 : vector<2x128x1xf32> to vector<2x128x256xf32>
    %20 = arith.mulf %0, %19 : vector<2x128x256xf32>
    %c0_14 = arith.constant 0 : index
    %c0_15 = arith.constant 0 : index
    %c0_16 = arith.constant 0 : index
    %21 = vector.load %arg3[%c0_14, %c0_15, %c0_16] : memref<2x128x256xf32, #tpu.memory_space<vmem>>, vector<2x128x256xf32>
    tpu.vector_store %arg3[%c0_14, %c0_15, %c0_16], %20 {strides = array<i32>} : memref<2x128x256xf32, #tpu.memory_space<vmem>>, vector<2x128x256xf32>,
    return
  }
}

</mosaic_0001>

<bundles_post_ra>
// kernel: tpu_custom_call.1
= control target key start
LH: loop header
LB: loop body
LE: loop exit
PB: predicated region body
PF: predicated region fallthrough
CT: control target
= control target key end

     0   :  { %8 = vsyncpa [#allocation3], 0  ;;  %s1555_s0 = inlined_call_operand.hbm [shape: f32[2,128,256], index: 0, kind: input, shape index: {}]   ;;  %s1556_s1 = inlined_call_operand.vmem [shape: f32[128,32], index: 1, kind: input, shape index: {}]   ;;  %s1557_s2 = inlined_call_operand.vmem [shape: f32[32,128], index: 2, kind: input, shape index: {}]   ;;  %s1558_s3 = inlined_call_operand.hbm [shape: f32[2,128,256], index: 3, kind: output, shape index: {}]  }
   0x1   :  { %9 = vsyncpa [#allocation4], 0  ;;  %s1047_s12 = smov [#allocation2]   ;;  %s999_s16 = scalar_lea.hbm %s1555_s0, 8192 }
   0x2   :  { %s15_s13 = sshll.u32 %s1047_s12, 4  ;;  %p1000_p0 = scmp.ne.s32.totalorder %s1555_s0, %s999_s16  ;;  %s16_s13 = int_to_ptr.vmem [resolvable:$true] %s15_s13 }
   0x3   :  { %p1003_p1 = scmp.lt.u32.totalorder %s999_s16, %s1555_s0 }
   0x5   :  { %p1005_p2 = pnand %p1003_p1, %p1000_p0 }
   0x7   :  { %1008 = shalt.err (!%p1005_p2)
}
   0x8   :  { %s1009_s21 = scalar_lea.vmem %s16_s13, 8192  ;;  %p1014_p4 = scmp.lt.s32.totalorder %s16_s13, %s16_s13 }
   0x9   :  { %p1010_p3 = scmp.ne.s32.totalorder %s16_s13, %s1009_s21  ;;  %p1015_p5 = scmp.lt.s32.totalorder %s1009_s21, %s1009_s21 }
   0xb   :  { %p1016_p6 = por %p1015_p5, %p1014_p4 }
   0xd   :  { %p1017_p7 = pnand %p1016_p6, %p1010_p3 }
   0xf   :  { %1020 = shalt.err (!%p1017_p7)
}
  0x10   :  { %s1048_s22 = smov 256   ;;  %s1049_s23 = smov 16  }
  0x11   :  { %21 = dma.hbm_to_vmem [thread:$0]  %s1555_s0, 8192, %s16_s13, [#allocation3], %s1048_s22, %s1048_s22, %s1049_s23  }
  0x12   :  { %1043 = dma.done.wait [#allocation3], 8192  }
  0x13   :  { %1044 = vsyncadd [#allocation3], 4294959104  ;;  %v1089_v0 = vld [vmem:[#allocation2 + $0x100] sm:$0xff]  ;;  %v1091_v1 = vld [vmem:[#allocation2 + $0x108] sm:$0xff]  ;;  %vm1051_vm0 = vmmov 0   ;;  %vm280_vm1 = vcmask 130112  }
  0x14   :  { %1611 = vst [vmem:[#allocation8_spill] sm:$0xff] %v1089_v0  ;;  %1612 = vst [vmem:[#allocation9_spill] sm:$0xff] %v1091_v1  ;;  %v1093_v2 = vld [vmem:[#allocation2] sm:$0xff]  ;;  %v141_v3 = vadd.f32 %v1091_v1, %v1089_v0  ;;  %v1097_v4 = vld [vmem:[#allocation2 + $0x8] sm:$0xff]  ;;  %vm287_vm2 = vcmask 195712   ;;  %vm294_vm3 = vcmask 261312  }
  0x15   :  { %v1099_v5 = vld [vmem:[#allocation2 + $0x110] sm:$0xff]  ;;  %v1101_v6 = vld [vmem:[#allocation2 + $0x118] sm:$0xff]  ;;  %v93_v7 = vadd.f32 %v1097_v4, %v1093_v2  ;;  %v1113_v12 = vld [vmem:[#allocation2 + $0x120] sm:$0xff]  ;;  %vm301_vm4 = vcmask 326912   ;;  %vm308_vm5 = vcmask 392512   ;;  %vm315_vm6 = vcmask 458112  }
  0x16   :  { %1613 = vst [vmem:[#allocation10_spill] sm:$0xff] %v1099_v5  ;;  %1614 = vst [vmem:[#allocation11_spill] sm:$0xff] %v1101_v6  ;;  %v1105_v8 = vld [vmem:[#allocation2 + $0x10] sm:$0xff]  ;;  %v1107_v9 = vld [vmem:[#allocation2 + $0x18] sm:$0xff]  ;;  %142 = vadd.xlane.f32.xlu1 %v141_v3  ;;  %v144_v10 = vadd.f32 %v1101_v6, %v1099_v5  ;;  %vm322_vm7 = vcmask 523712   ;;  %vm329_vm8 = vcmask 589312  }
  0x17   :  { %94 = vadd.xlane.f32.xlu0 %v93_v7  ;;  %v96_v11 = vadd.f32 %v1107_v9, %v1105_v8  ;;  %1615 = vst [vmem:[#allocation12_spill] sm:$0xff] %v1113_v12  ;;  %v1115_v13 = vld [vmem:[#allocation2 + $0x128] sm:$0xff]  ;;  %v1117_v14 = vld [vmem:[#allocation2 + $0x20] sm:$0xff]  ;;  %v1125_v18 = vld [vmem:[#allocation2 + $0x130] sm:$0xff]  ;;  %vm336_vm9 = vcmask 654912   ;;  %vm343_vm10 = vcmask 720512  }
  0x18   :  { %1616 = vst [vmem:[#allocation13_spill] sm:$0xff] %v1115_v13  ;;  %v1119_v15 = vld [vmem:[#allocation2 + $0x28] sm:$0xff]  ;;  %v147_v16 = vadd.f32 %v1115_v13, %v1113_v12  ;;  %1617 = vst [vmem:[#allocation14_spill] sm:$0xff] %v1125_v18  ;;  %v1127_v19 = vld [vmem:[#allocation2 + $0x138] sm:$0xff]  ;;  %vm350_vm11 = vcmask 786112   ;;  %vm357_vm12 = vcmask 851712  }
  0x19   :  { %v99_v17 = vadd.f32 %v1119_v15, %v1117_v14  ;;  %1618 = vst [vmem:[#allocation15_spill] sm:$0xff] %v1127_v19  ;;  %v1129_v20 = vld [vmem:[#allocation2 + $0x30] sm:$0xff]  ;;  %v1131_v21 = vld [vmem:[#allocation2 + $0x38] sm:$0xff]  ;;  %v150_v22 = vadd.f32 %v1127_v19, %v1125_v18  ;;  %v1137_v24 = vld [vmem:[#allocation2 + $0x140] sm:$0xff]  ;;  %vm364_vm13 = vcmask 917312   ;;  %vm371_vm14 = vcmask 982912  }
  0x1a   :  { %145 = vadd.xlane.f32.xlu1 %v144_v10  ;;  %v102_v23 = vadd.f32 %v1131_v21, %v1129_v20  ;;  %1619 = vst [vmem:[#allocation16_spill] sm:$0xff] %v1137_v24  ;;  %v1139_v25 = vld [vmem:[#allocation2 + $0x148] sm:$0xff]  ;;  %v1141_v26 = vld [vmem:[#allocation2 + $0x40] sm:$0xff]  ;;  %v1149_v30 = vld [vmem:[#allocation2 + $0x150] sm:$0xff]  ;;  %vm378_vm15 = vcmask 1048512  }
  0x1b   :  { %97 = vadd.xlane.f32.xlu0 %v96_v11  ;;  %1620 = vst [vmem:[#allocation17_spill] sm:$0xff] %v1139_v25  ;;  %v1143_v27 = vld [vmem:[#allocation2 + $0x48] sm:$0xff]  ;;  %v153_v28 = vadd.f32 %v1139_v25, %v1137_v24  ;;  %1621 = vst [vmem:[#allocation18_spill] sm:$0xff] %v1149_v30  ;;  %v1151_v31 = vld [vmem:[#allocation2 + $0x158] sm:$0xff] }
  0x1c   :  { %v105_v29 = vadd.f32 %v1143_v27, %v1141_v26  ;;  %1622 = vst [vmem:[#allocation19_spill] sm:$0xff] %v1151_v31  ;;  %v1153_v32 = vld [vmem:[#allocation2 + $0x50] sm:$0xff]  ;;  %v1155_v33 = vld [vmem:[#allocation2 + $0x58] sm:$0xff]  ;;  %v156_v34 = vadd.f32 %v1151_v31, %v1149_v30  ;;  %v1161_v36 = vld [vmem:[#allocation2 + $0x160] sm:$0xff] }
  0x1d   :  { %1623 = vst [vmem:[#allocation20_spill] sm:$0xff] %v1153_v32  ;;  %1624 = vst [vmem:[#allocation21_spill] sm:$0xff] %v1155_v33  ;;  %v108_v35 = vadd.f32 %v1155_v33, %v1153_v32  ;;  %v1163_v37 = vld [vmem:[#allocation2 + $0x168] sm:$0xff]  ;;  %v1165_v38 = vld [vmem:[#allocation2 + $0x60] sm:$0xff] }
  0x1e   :  { %148 = vadd.xlane.f32.xlu1 %v147_v16  ;;  %1625 = vst [vmem:[#allocation22_spill] sm:$0xff] %v1161_v36  ;;  %1626 = vst [vmem:[#allocation23_spill] sm:$0xff] %v1163_v37  ;;  %v1167_v39 = vld [vmem:[#allocation2 + $0x68] sm:$0xff]  ;;  %v159_v40 = vadd.f32 %v1163_v37, %v1161_v36  ;;  %v1173_v42 = vld [vmem:[#allocation2 + $0x170] sm:$0xff] }
  0x1f   :  { %100 = vadd.xlane.f32.xlu0 %v99_v17  ;;  %v111_v41 = vadd.f32 %v1167_v39, %v1165_v38  ;;  %1627 = vst [vmem:[#allocation24_spill] sm:$0xff] %v1173_v42  ;;  %v1175_v43 = vld [vmem:[#allocation2 + $0x178] sm:$0xff]  ;;  %v1177_v44 = vld [vmem:[#allocation2 + $0x70] sm:$0xff]  ;;  %v1185_v48 = vld [vmem:[#allocation2 + $0x180] sm:$0xff] }
  0x20   :  { %1628 = vst [vmem:[#allocation25_spill] sm:$0xff] %v1175_v43  ;;  %1629 = vst [vmem:[#allocation26_spill] sm:$0xff] %v1177_v44  ;;  %v1179_v45 = vld [vmem:[#allocation2 + $0x78] sm:$0xff]  ;;  %v162_v46 = vadd.f32 %v1175_v43, %v1173_v42  ;;  %v1187_v49 = vld [vmem:[#allocation2 + $0x188] sm:$0xff] }
  0x21   :  { %1630 = vst [vmem:[#allocation27_spill] sm:$0xff] %v1179_v45  ;;  %v114_v47 = vadd.f32 %v1179_v45, %v1177_v44  ;;  %1631 = vst [vmem:[#allocation28_spill] sm:$0xff] %v1185_v48  ;;  %v1189_v50 = vld [vmem:[#allocation2 + $0x80] sm:$0xff]  ;;  %v1191_v51 = vld [vmem:[#allocation2 + $0x88] sm:$0xff]  ;;  %v165_v52 = vadd.f32 %v1187_v49, %v1185_v48 }
  0x22   :  { %151 = vadd.xlane.f32.xlu1 %v150_v22  ;;  %1632 = vst [vmem:[#allocation29_spill] sm:$0xff] %v1187_v49  ;;  %1633 = vst [vmem:[#allocation30_spill] sm:$0xff] %v1189_v50  ;;  %v117_v53 = vadd.f32 %v1191_v51, %v1189_v50  ;;  %v1197_v54 = vld [vmem:[#allocation2 + $0x190] sm:$0xff]  ;;  %v1199_v55 = vld [vmem:[#allocation2 + $0x198] sm:$0xff] }
  0x23   :  { %103 = vadd.xlane.f32.xlu0 %v102_v23  ;;  %1634 = vst [vmem:[#allocation31_spill] sm:$0xff] %v1191_v51  ;;  %1635 = vst [vmem:[#allocation32_spill] sm:$0xff] %v1197_v54  ;;  %v1201_v56 = vld [vmem:[#allocation2 + $0x90] sm:$0xff]  ;;  %v1203_v57 = vld [vmem:[#allocation2 + $0x98] sm:$0xff]  ;;  %v168_v58 = vadd.f32 %v1199_v55, %v1197_v54 }
  0x24   :  { %1636 = vst [vmem:[#allocation33_spill] sm:$0xff] %v1199_v55  ;;  %1637 = vst [vmem:[#allocation34_spill] sm:$0xff] %v1201_v56  ;;  %v120_v59 = vadd.f32 %v1203_v57, %v1201_v56  ;;  %v1209_v60 = vld [vmem:[#allocation2 + $0x1a0] sm:$0xff]  ;;  %v1211_v61 = vld [vmem:[#allocation2 + $0x1a8] sm:$0xff] }
  0x25   :  { %1638 = vst [vmem:[#allocation35_spill] sm:$0xff] %v1203_v57  ;;  %1639 = vst [vmem:[#allocation36_spill] sm:$0xff] %v1209_v60  ;;  %v1213_v62 = vld [vmem:[#allocation2 + $0xa0] sm:$0xff]  ;;  %v1215_v63 = vld [vmem:[#allocation2 + $0xa8] sm:$0xff]  ;;  %v171_v3 = vadd.f32 %v1211_v61, %v1209_v60 }
  0x26   :  { %154 = vadd.xlane.f32.xlu1 %v153_v28  ;;  %1640 = vst [vmem:[#allocation37_spill] sm:$0xff] %v1211_v61  ;;  %1641 = vst [vmem:[#allocation38_spill] sm:$0xff] %v1213_v62  ;;  %v123_v7 = vadd.f32 %v1215_v63, %v1213_v62  ;;  %v1221_v10 = vld [vmem:[#allocation2 + $0x1b0] sm:$0xff]  ;;  %v1223_v11 = vld [vmem:[#allocation2 + $0x1b8] sm:$0xff] }
  0x27   :  { %106 = vadd.xlane.f32.xlu0 %v105_v29  ;;  %1642 = vst [vmem:[#allocation39_spill] sm:$0xff] %v1215_v63  ;;  %1643 = vst [vmem:[#allocation40_spill] sm:$0xff] %v1221_v10  ;;  %v1225_v16 = vld [vmem:[#allocation2 + $0xb0] sm:$0xff]  ;;  %v1227_v17 = vld [vmem:[#allocation2 + $0xb8] sm:$0xff]  ;;  %v174_v22 = vadd.f32 %v1223_v11, %v1221_v10  ;;  %v1050_v10 = vmov 0.0|0.0  }
  0x28   :  { %1644 = vst [vmem:[#allocation41_spill] sm:$0xff] %v1223_v11  ;;  %1645 = vst [vmem:[#allocation42_spill] sm:$0xff] %v1225_v16  ;;  %v126_v23 = vadd.f32 %v1227_v17, %v1225_v16  ;;  %v1233_v28 = vld [vmem:[#allocation2 + $0x1c0] sm:$0xff]  ;;  %v1235_v29 = vld [vmem:[#allocation2 + $0x1c8] sm:$0xff]  ;;  %962 = vmatprep.subr.bf16.mxu0 %v1050_v10  ;;  %986 = vmatprep.subr.bf16.mxu1 %v1050_v10 }
  0x29   :  { %1646 = vst [vmem:[#allocation43_spill] sm:$0xff] %v1227_v17  ;;  %1647 = vst [vmem:[#allocation44_spill] sm:$0xff] %v1233_v28  ;;  %v1265_v11 = vld [vmem:[#allocation2 + $0x1e8] sm:$0xff]  ;;  %v1285_v55 = vld [vmem:[#allocation2 + $0xf0] sm:$0xff] }
  0x2a   :  { %157 = vadd.xlane.f32.xlu1 %v156_v34  ;;  %1648 = vst [vmem:[#allocation45_spill] sm:$0xff] %v1235_v29  ;;  %v1237_v34 = vld [vmem:[#allocation2 + $0xc0] sm:$0xff]  ;;  %1656 = vst [vmem:[#allocation53_spill] sm:$0xff] %v1265_v11  ;;  %v1287_v54 = vld [vmem:[#allocation2 + $0xf8] sm:$0xff] }
  0x2b   :  { %109 = vadd.xlane.f32.xlu0 %v108_v35  ;;  %1649 = vst [vmem:[#allocation46_spill] sm:$0xff] %v1237_v34  ;;  %v1239_v35 = vld [vmem:[#allocation2 + $0xc8] sm:$0xff]  ;;  %1661 = vst [vmem:[#allocation58_spill] sm:$0xff] %v1285_v55 }
  0x2c   :  { %1650 = vst [vmem:[#allocation47_spill] sm:$0xff] %v1239_v35  ;;  %1662 = vst [vmem:[#allocation59_spill] sm:$0xff] %v1287_v54 }
  0x2e   :  { %160 = vadd.xlane.f32.xlu1 %v159_v40  ;;  %v177_v40 = vadd.f32 %v1235_v29, %v1233_v28  ;;  %v1267_v29 = vld [vmem:[#allocation2 + $0xe0] sm:$0xff]  ;;  %v1269_v28 = vld [vmem:[#allocation2 + $0xe8] sm:$0xff] }
  0x2f   :  { %112 = vadd.xlane.f32.xlu0 %v111_v41  ;;  %v129_v41 = vadd.f32 %v1239_v35, %v1237_v34  ;;  %1657 = vst [vmem:[#allocation54_spill] sm:$0xff] %v1267_v29  ;;  %1658 = vst [vmem:[#allocation55_spill] sm:$0xff] %v1269_v28 }
  0x32   :  { %163 = vadd.xlane.f32.xlu1 %v162_v46  ;;  %v1245_v46 = vld [vmem:[#allocation2 + $0x1d0] sm:$0xff] }
  0x33   :  { %115 = vadd.xlane.f32.xlu0 %v114_v47  ;;  %1651 = vst [vmem:[#allocation48_spill] sm:$0xff] %v1245_v46  ;;  %v1247_v47 = vld [vmem:[#allocation2 + $0x1d8] sm:$0xff] }
  0x34   :  { %1652 = vst [vmem:[#allocation49_spill] sm:$0xff] %v1247_v47 }
  0x36   :  { %166 = vadd.xlane.f32.xlu1 %v165_v52  ;;  %v1249_v52 = vld [vmem:[#allocation2 + $0xd0] sm:$0xff] }
  0x37   :  { %118 = vadd.xlane.f32.xlu0 %v117_v53  ;;  %1653 = vst [vmem:[#allocation50_spill] sm:$0xff] %v1249_v52  ;;  %v1251_v53 = vld [vmem:[#allocation2 + $0xd8] sm:$0xff] }
  0x38   :  { %1654 = vst [vmem:[#allocation51_spill] sm:$0xff] %v1251_v53 }
  0x3a   :  { %169 = vadd.xlane.f32.xlu1 %v168_v58  ;;  %v221_v58 = vld [vmem:[%s1556_s1] sm:$0xff] }
  0x3b   :  { %121 = vadd.xlane.f32.xlu0 %v120_v59  ;;  %v222_v59 = vld [vmem:[%s1556_s1 + $0x8] sm:$0xff] }
  0x3e   :  { %172 = vadd.xlane.f32.xlu1 %v171_v3  ;;  %v180_v3 = vadd.f32 %v1247_v47, %v1245_v46  ;;  %v135_v47 = vadd.f32 %v1269_v28, %v1267_v29  ;;  %v1283_v46 = vld [vmem:[#allocation2 + $0x1f8] sm:$0xff] }
  0x3f   :  { %124 = vadd.xlane.f32.xlu0 %v123_v7  ;;  %v963_v7 = vpack.c.bf16 %v222_v59, %v221_v58  ;;  %1660 = vst [vmem:[#allocation57_spill] sm:$0xff] %v1283_v46 }
  0x41   :  { %964 = vmatpush3.bf16.msra.mxu0 %v963_v7  ;;  %v1281_v7 = vld [vmem:[#allocation2 + $0x1f0] sm:$0xff] }
  0x42   :  { %175 = vadd.xlane.f32.xlu1 %v174_v22  ;;  %v132_v22 = vadd.f32 %v1251_v53, %v1249_v52  ;;  %965 = vmatprep.subr.bf16.mxu0 %v1050_v10  ;;  %1659 = vst [vmem:[#allocation56_spill] sm:$0xff] %v1281_v7 }
  0x43   :  { %127 = vadd.xlane.f32.xlu0 %v126_v23  ;;  %v1263_v23 = vld [vmem:[#allocation2 + $0x1e0] sm:$0xff] }
  0x44   :  { %1655 = vst [vmem:[#allocation52_spill] sm:$0xff] %v1263_v23  ;;  %v183_v58 = vadd.f32 %v1265_v11, %v1263_v23  ;;  %v138_v11 = vadd.f32 %v1287_v54, %v1285_v55  ;;  %v228_v23 = vld [vmem:[%s1556_s1 + $0x38] sm:$0xff] }
  0x46   :  { %178 = vadd.xlane.f32.xlu1 %v177_v40  ;;  %v223_v40 = vld [vmem:[%s1556_s1 + $0x10] sm:$0xff] }
  0x47   :  { %130 = vadd.xlane.f32.xlu0 %v129_v41  ;;  %v224_v41 = vld [vmem:[%s1556_s1 + $0x18] sm:$0xff] }
  0x48   :  { %v966_v59 = vpack.c.bf16 %v224_v41, %v223_v40  ;;  %v186_v40 = vadd.f32 %v1283_v46, %v1281_v7 }
  0x4a   :  { %181 = vadd.xlane.f32.xlu1 %v180_v3  ;;  %967 = vmatpush3.bf16.msra.mxu0 %v966_v59  ;;  %v225_v3 = vld [vmem:[%s1556_s1 + $0x20] sm:$0xff]  ;;  %v227_v59 = vld [vmem:[%s1556_s1 + $0x30] sm:$0xff] }
  0x4b   :  { %133 = vadd.xlane.f32.xlu0 %v132_v22  ;;  %968 = vmatprep.subr.bf16.mxu0 %v1050_v10  ;;  %v226_v22 = vld [vmem:[%s1556_s1 + $0x28] sm:$0xff] }
  0x4c   :  { %v969_v41 = vpack.c.bf16 %v226_v22, %v225_v3  ;;  %v230_v3 = vld [vmem:[%s1556_s1 + $0x48] sm:$0xff] }
  0x4e   :  { %184 = vadd.xlane.f32.xlu1 %v183_v58  ;;  %970 = vmatpush3.bf16.msra.mxu0 %v969_v41  ;;  %v972_v58 = vpack.c.bf16 %v228_v23, %v227_v59  ;;  %v231_v41 = vld [vmem:[%s1556_s1 + $0x50] sm:$0xff]  ;;  %v234_v59 = vld [vmem:[%s1556_s1 + $0x68] sm:$0xff] }
  0x4f   :  { %136 = vadd.xlane.f32.xlu0 %v135_v47  ;;  %971 = vmatprep.subr.bf16.mxu0 %v1050_v10  ;;  %v229_v47 = vld [vmem:[%s1556_s1 + $0x40] sm:$0xff] }
  0x50   :  { %v975_v22 = vpack.c.bf16 %v230_v3, %v229_v47  ;;  %v235_v47 = vld [vmem:[%s1556_s1 + $0x70] sm:$0xff]  ;;  %v236_v3 = vld [vmem:[%s1556_s1 + $0x78] sm:$0xff] }
  0x52   :  { %187 = vadd.xlane.f32.xlu1 %v186_v40  ;;  %973 = vmatpush3.bf16.msra.mxu0 %v972_v58  ;;  %v233_v40 = vld [vmem:[%s1556_s1 + $0x60] sm:$0xff] }
  0x53   :  { %139 = vadd.xlane.f32.xlu0 %v138_v11  ;;  %974 = vmatprep.subr.bf16.mxu0 %v1050_v10  ;;  %v232_v11 = vld [vmem:[%s1556_s1 + $0x58] sm:$0xff]  ;;  %v981_v58 = vpack.c.bf16 %v234_v59, %v233_v40 }
  0x54   :  { %v978_v23 = vpack.c.bf16 %v232_v11, %v231_v41  ;;  %v1052_v41 = vmov 0.0   ;;  %v533_v11 = vld [vmem:[%s1557_s2] sm:$0xff] }
  0x55   :  { %948 = vmatprep.mubr.msk.f32.mxu0 %vm1051_vm0, %v1052_v41  ;;  %959 = vmatprep.mubr.msk.f32.mxu1 %vm1051_vm0, %v1052_v41  ;;  %vm459_vm0 = vcmask 1041409  }
  0x56   :  { %976 = vmatpush3.bf16.msra.mxu0 %v975_v22  ;;  %v984_v22 = vpack.c.bf16 %v236_v3, %v235_v47 }
  0x57   :  { %977 = vmatprep.subr.bf16.mxu0 %v1050_v10 }
  0x5a   :  { %979 = vmatpush3.bf16.msra.mxu0 %v978_v23  ;;  %v534_v23 = vld [vmem:[%s1557_s2 + $0x8] sm:$0xff] }
  0x5b   :  { %980 = vmatprep.subr.bf16.mxu0 %v1050_v10  ;;  %v987_v40 = vpack.c.bf16 %v534_v23, %v533_v11  ;;  %v269_v11 = vlaneseq }
  0x5d   :  { %988 = vmatpush3.bf16.msra.mxu1 %v987_v40  ;;  %v270_v40 = vand.u32 127, %v269_v11  ;;  %v1345_v31 = vshrl.u32 %v269_v11, 7 }
  0x5e   :  { %982 = vmatpush3.bf16.msra.mxu0 %v981_v58  ;;  %989 = vmatprep.subr.bf16.mxu1 %v1050_v10 }
  0x5f   :  { %983 = vmatprep.subr.bf16.mxu0 %v1050_v10  ;;  %v275_v30 = vadd.s32 4294967288, %v270_v40  ;;  %v282_v37 = vadd.s32 4294967280, %v270_v40  ;;  %v289_v19 = vadd.s32 4294967272, %v270_v40  ;;  %v296_v18 = vadd.s32 4294967264, %v270_v40 }
  0x60   :  { %v303_v24 = vadd.s32 4294967256, %v270_v40  ;;  %v310_v6 = vadd.s32 4294967248, %v270_v40  ;;  %v317_v5 = vadd.s32 4294967240, %v270_v40  ;;  %v1352_v13 = vsub.s32 %v270_v40, %v1345_v31 }
  0x61   :  { %v324_v12 = vadd.s32 4294967232, %v270_v40  ;;  %v331_v54 = vadd.s32 4294967224, %v270_v40  ;;  %v338_v55 = vadd.s32 4294967216, %v270_v40  ;;  %v278_v11 = vsub.s32 %v275_v30, %v1345_v31 }
  0x62   :  { %985 = vmatpush3.bf16.msra.mxu0 %v984_v22  ;;  %v1356_v1 = vsub.s32 %v282_v37, %v1345_v31  ;;  %v345_v53 = vadd.s32 4294967208, %v270_v40  ;;  %v1361_v52 = vsub.s32 %v289_v19, %v1345_v31  ;;  %v1364_v28 = vsub.s32 %v296_v18, %v1345_v31 }
  0x63   :  { %v352_v17 = vadd.s32 4294967200, %v270_v40  ;;  %v1369_v30 = vsub.s32 %v303_v24, %v1345_v31  ;;  %v1372_v37 = vsub.s32 %v310_v6, %v1345_v31  ;;  %v1375_v16 = vsub.s32 %v317_v5, %v1345_v31 }
  0x64   :  { %v359_v35 = vadd.s32 4294967192, %v270_v40  ;;  %v1378_v19 = vsub.s32 %v324_v12, %v1345_v31  ;;  %v1381_v18 = vsub.s32 %v331_v54, %v1345_v31  ;;  %v1384_v57 = vsub.s32 %v338_v55, %v1345_v31 }
  0x65   :  { %v1387_v63 = vsub.s32 %v345_v53, %v1345_v31  ;;  %v366_v5 = vadd.s32 4294967184, %v270_v40  ;;  %v1390_v12 = vsub.s32 %v352_v17, %v1345_v31  ;;  %v373_v53 = vadd.s32 4294967176, %v270_v40 }
  0x66   :  { %v1393_v55 = vsub.s32 %v359_v35, %v1345_v31 }
  0x67   :  { %v1398_v17 = vsub.s32 %v366_v5, %v1345_v31 }
  0xa3   :  { %v143_v59 = vpop.xlane.xlu1 %142 }
  0xa4   :  { %v95_v58 = vpop.xlane.xlu0 %94  ;;  %v205_v62 = vmul.f32 0.00390625, %v143_v59 }
  0xa5   :  { %v189_v54 = vmul.f32 0.00390625, %v95_v58 }
  0xa7   :  { %v146_v46 = vpop.xlane.xlu1 %145 }
  0xa8   :  { %v98_v47 = vpop.xlane.xlu0 %97  ;;  %v206_v34 = vmul.f32 0.00390625, %v146_v46 }
  0xa9   :  { %v190_v24 = vmul.f32 0.00390625, %v98_v47 }
  0xaa   :  { %v387_v47 = vrot.slane %v206_v34, %v278_v11 }
  0xab   :  { %v149_v3 = vpop.xlane.xlu1 %148  ;;  %v279_v32 = vrot.slane %v190_v24, %v278_v11 }
  0xac   :  { %v101_v22 = vpop.xlane.xlu0 %100  ;;  %v207_v56 = vmul.f32 0.00390625, %v149_v3 }
  0xad   :  { %v191_v46 = vmul.f32 0.00390625, %v101_v22 }
  0xae   :  { %v392_v59 = vrot.slane %v207_v56, %v1356_v1 }
  0xaf   :  { %v152_v7 = vpop.xlane.xlu1 %151  ;;  %v286_v58 = vrot.slane %v191_v46, %v1356_v1 }
  0xb0   :  { %v104_v61 = vpop.xlane.xlu0 %103  ;;  %v208_v45 = vmul.f32 0.00390625, %v152_v7 }
  0xb1   :  { %v192_v51 = vmul.f32 0.00390625, %v104_v61  ;;  %v383_v61 = vrot.slane %v205_v62, %v1352_v13 }
  0xb2   :  { %v397_v35 = vrot.slane %v208_v45, %v1361_v52  ;;  %v1412_v45 = vsub.s32 %v373_v53, %v1345_v31 }
  0xb3   :  { %v155_v41 = vpop.xlane.xlu1 %154  ;;  %v293_v56 = vrot.slane %v192_v51, %v1361_v52  ;;  %v388_v40 = vsel %vm280_vm1, %v387_v47, %v383_v61 }
  0xb4   :  { %v107_v60 = vpop.xlane.xlu0 %106  ;;  %v209_v50 = vmul.f32 0.00390625, %v155_v41 }
  0xb5   :  { %v193_v3 = vmul.f32 0.00390625, %v107_v60  ;;  %v274_v60 = vrot.slane %v189_v54, %v1352_v13  ;;  %v393_v13 = vsel %vm287_vm2, %v392_v59, %v388_v40 }
  0xb7   :  { %v158_v43 = vpop.xlane.xlu1 %157  ;;  %v300_v62 = vrot.slane %v193_v3, %v1364_v28 }
  0xb8   :  { %v1335_v42 = vpop.xlane.xlu0 %109  ;;  %v210_v33 = vmul.f32 0.00390625, %v158_v43 }
  0xb9   :  { %v194_v7 = vmul.f32 0.00390625, %v1335_v42  ;;  %v402_v42 = vrot.slane %v209_v50, %v1364_v28  ;;  %v398_v28 = vsel %vm294_vm3, %v397_v35, %v393_v13 }
  0xba   :  { %v407_v1 = vrot.slane %v210_v33, %v1369_v30 }
  0xbb   :  { %v1337_v49 = vpop.xlane.xlu1 %160  ;;  %v307_v51 = vrot.slane %v194_v7, %v1369_v30  ;;  %v403_v5 = vsel %vm301_vm4, %v402_v42, %v398_v28 }
  0xbc   :  { %v1339_v48 = vpop.xlane.xlu0 %112  ;;  %v211_v34 = vmul.f32 0.00390625, %v1337_v49  ;;  %v281_v49 = vsel %vm280_vm1, %v279_v32, %v274_v60  ;;  %v408_v54 = vsel %vm308_vm5, %v407_v1, %v403_v5  ;;  %vm537_vm1 = vcmask 261120  }
  0xbd   :  { %v195_v41 = vmul.f32 0.00390625, %v1339_v48  ;;  %v288_v52 = vsel %vm287_vm2, %v286_v58, %v281_v49 }
  0xbe   :  { %v412_v33 = vrot.slane %v211_v34, %v1372_v37  ;;  %v295_v32 = vsel %vm294_vm3, %v293_v56, %v288_v52 }
  0xbf   :  { %v1341_v23 = vpop.xlane.xlu1 %163  ;;  %v314_v30 = vrot.slane %v195_v41, %v1372_v37  ;;  %v302_v46 = vsel %vm301_vm4, %v300_v62, %v295_v32 }
  0xc0   :  { %v1343_v10 = vpop.xlane.xlu0 %115  ;;  %v212_v50 = vmul.f32 0.00390625, %v1341_v23 }
  0xc1   :  { %v196_v11 = vmul.f32 0.00390625, %v1343_v10  ;;  %v309_v10 = vsel %vm308_vm5, %v307_v51, %v302_v46 }
  0xc2   :  { %v417_v53 = vrot.slane %v212_v50, %v1375_v16 }
  0xc3   :  { %v1347_v36 = vpop.xlane.xlu1 %166  ;;  %v321_v61 = vrot.slane %v196_v11, %v1375_v16 }
  0xc4   :  { %v1349_v25 = vpop.xlane.xlu0 %118  ;;  %v213_v23 = vmul.f32 0.00390625, %v1347_v36  ;;  %v413_v36 = vsel %vm315_vm6, %v412_v33, %v408_v54 }
  0xc5   :  { %v197_v47 = vmul.f32 0.00390625, %v1349_v25  ;;  %v418_v40 = vsel %vm322_vm7, %v417_v53, %v413_v36 }
  0xc6   :  { %v422_v25 = vrot.slane %v213_v23, %v1378_v19 }
  0xc7   :  { %v1358_v0 = vpop.xlane.xlu1 %169  ;;  %v328_v42 = vrot.slane %v197_v47, %v1378_v19 }
  0xc8   :  { %v1366_v29 = vpop.xlane.xlu0 %121  ;;  %v214_v3 = vmul.f32 0.00390625, %v1358_v0  ;;  %v316_v0 = vsel %vm315_vm6, %v314_v30, %v309_v10  ;;  %v423_v51 = vsel %vm329_vm8, %v422_v25, %v418_v40 }
  0xc9   :  { %v198_v59 = vmul.f32 0.00390625, %v1366_v29  ;;  %v323_v1 = vsel %vm322_vm7, %v321_v61, %v316_v0  ;;  %v536_v0 = vld [vmem:[%s1557_s2 + $0x18] sm:$0xff] }
  0xca   :  { %v427_v29 = vrot.slane %v214_v3, %v1381_v18 }
  0xcb   :  { %v173_v6 = vpop.xlane.xlu1 %172  ;;  %v335_v16 = vrot.slane %v198_v59, %v1381_v18  ;;  %v330_v18 = vsel %vm329_vm8, %v328_v42, %v323_v1 }
  0xcc   :  { %v125_v44 = vpop.xlane.xlu0 %124  ;;  %v215_v7 = vmul.f32 0.00390625, %v173_v6  ;;  %v428_v28 = vsel %vm336_vm9, %v427_v29, %v423_v51 }
  0xcd   :  { %v199_v58 = vmul.f32 0.00390625, %v125_v44 }
  0xce   :  { %v432_v44 = vrot.slane %v215_v7, %v1384_v57 }
  0xcf   :  { %v176_v22 = vpop.xlane.xlu1 %175  ;;  %v342_v49 = vrot.slane %v199_v58, %v1384_v57  ;;  %v337_v57 = vsel %vm336_vm9, %v335_v16, %v330_v18  ;;  %v616_v16 = vsub.s32 0, %v1345_v31 }
  0xd0   :  { %v128_v43 = vpop.xlane.xlu0 %127  ;;  %v216_v35 = vmul.f32 0.00390625, %v176_v22 }
  0xd1   :  { %v200_v60 = vmul.f32 0.00390625, %v128_v43  ;;  %v344_v30 = vsel %vm343_vm10, %v342_v49, %v337_v57 }
  0xd2   :  { %v437_v43 = vrot.slane %v216_v35, %v1387_v63 }
  0xd3   :  { %v179_v48 = vpop.xlane.xlu1 %178  ;;  %v349_v50 = vrot.slane %v200_v60, %v1387_v63 }
  0xd4   :  { %v131_v24 = vpop.xlane.xlu0 %130  ;;  %v217_v56 = vmul.f32 0.00390625, %v179_v48 }
  0xd5   :  { %v201_v6 = vmul.f32 0.00390625, %v131_v24  ;;  %v433_v24 = vsel %vm343_vm10, %v432_v44, %v428_v28 }
  0xd6   :  { %v442_v48 = vrot.slane %v217_v56, %v1390_v12  ;;  %v438_v23 = vsel %vm350_vm11, %v437_v43, %v433_v24  ;;  %v1664_v24 = vld [vmem:[#allocation21_spill] sm:$0xff] }
  0xd7   :  { %v182_v37 = vpop.xlane.xlu1 %181  ;;  %v356_v33 = vrot.slane %v201_v6, %v1390_v12  ;;  %v351_v12 = vsel %vm350_vm11, %v349_v50, %v344_v30  ;;  %v1666_v30 = vld [vmem:[#allocation31_spill] sm:$0xff] }
  0xd8   :  { %v134_v34 = vpop.xlane.xlu0 %133  ;;  %v218_v41 = vmul.f32 0.00390625, %v182_v37  ;;  %v443_v3 = vsel %vm357_vm12, %v442_v48, %v438_v23 }
  0xd9   :  { %v202_v22 = vmul.f32 0.00390625, %v134_v34  ;;  %v358_v53 = vsel %vm357_vm12, %v356_v33, %v351_v12  ;;  %v535_v34 = vld [vmem:[%s1557_s2 + $0x10] sm:$0xff]  ;;  %s1053_s2 = smov [#allocation5]  }
  0xda   :  { %v447_v11 = vrot.slane %v218_v41, %v1393_v55  ;;  %v990_v25 = vpack.c.bf16 %v536_v0, %v535_v34  ;;  %s881_s11 = sshll.u32 %s1053_s2, 4  ;;  %s882_s11 = int_to_ptr.vmem [resolvable:$true] %s881_s11 }
  0xdb   :  { %v185_v62 = vpop.xlane.xlu1 %184  ;;  %v363_v32 = vrot.slane %v202_v22, %v1393_v55  ;;  %s1021_s12 = scalar_lea.vmem %s882_s11, 8192  ;;  %p1026_p9 = scmp.lt.s32.totalorder %s882_s11, %s882_s11 }
  0xdc   :  { %v219_v13 = vmul.f32 0.00390625, %v185_v62  ;;  %v137_v19 = vpop.xlane.xlu0 %136  ;;  %v448_v55 = vsel %vm364_vm13, %v447_v11, %v443_v3  ;;  %991 = vmatpush3.bf16.msra.mxu1 %v990_v25  ;;  %v683_v62 = vsub.s32 1, %v1345_v31  ;;  %v1670_v3 = vld [vmem:[#allocation39_spill] sm:$0xff]  ;;  %v1675_v25 = vld [vmem:[#allocation42_spill] sm:$0xff]  ;;  %p1022_p8 = scmp.ne.s32.totalorder %s882_s11, %s1021_s12  ;;  %p1027_p10 = scmp.lt.s32.totalorder %s1021_s12, %s1021_s12 }
  0xdd   :  { %v203_v52 = vmul.f32 0.00390625, %v137_v19  ;;  %v365_v7 = vsel %vm364_vm13, %v363_v32, %v358_v53 }
  0xde   :  { %v452_v5 = vrot.slane %v219_v13, %v1398_v17  ;;  %p1028_p11 = por %p1027_p10, %p1026_p9 }
  0xdf   :  { %v188_v63 = vpop.xlane.xlu1 %187  ;;  %v370_v46 = vrot.slane %v203_v52, %v1398_v17 }
  0xe0   :  { %v220_v54 = vmul.f32 0.00390625, %v188_v63  ;;  %v140_v47 = vpop.xlane.xlu0 %139  ;;  %v453_v17 = vsel %vm371_vm14, %v452_v5, %v448_v55  ;;  %v1665_v5 = vld [vmem:[#allocation30_spill] sm:$0xff]  ;;  %p1029_p12 = pnand %p1028_p11, %p1022_p8 }
  0xe1   :  { %v204_v10 = vmul.f32 0.00390625, %v140_v47  ;;  %v372_v36 = vsel %vm371_vm14, %v370_v46, %v365_v7  ;;  %v1668_v46 = vld [vmem:[#allocation27_spill] sm:$0xff]  ;;  %v1669_v47 = vld [vmem:[#allocation38_spill] sm:$0xff] }
  0xe2   :  { %v457_v59 = vrot.slane %v220_v54, %v1412_v45 }
  0xe3   :  { %v377_v37 = vrot.slane %v204_v10, %v1412_v45 }
  0xe4   :  { %v458_v61 = vsel %vm378_vm15, %v457_v59, %v453_v17  ;;  %v1671_v59 = vld [vmem:[#allocation34_spill] sm:$0xff] }
  0xe5   :  { %v379_v58 = vsel %vm378_vm15, %v377_v37, %v372_v36  ;;  %v1672_v37 = vld [vmem:[#allocation35_spill] sm:$0xff]  ;;  %v1673_v36 = vld [vmem:[#allocation46_spill] sm:$0xff] }
  0xe6   :  { %v460_v35 = vsel %vm459_vm0, %v458_v61, %v379_v58  ;;  %v1674_v58 = vld [vmem:[#allocation47_spill] sm:$0xff] }
  0xe7   :  { %949 = vmatmul.mubr.f32.vlgmr.msra.gmra.mrb[0].mxu0 %v460_v35 }
 0x1ba   :  { %v528_v45 = vpop.f32.mrb[0].mxu0 }
 0x1bb   :  { %v532_v60 = vmax.f32 %v528_v45, 0.0  ;;  %v950_v56 = vpop.f32.mrb[1].mxu0 }
 0x1bd   :  { %960 = vmatmul.mubr.msk.f32.vlgmr.msra.gmra.mrb[0].mxu1 %vm537_vm1, %v532_v60  ;;  %v1676_v60 = vld [vmem:[#allocation43_spill] sm:$0xff] }
 0x290   :  { %v607_v42 = vpop.f32.mrb[0].mxu1 }
 0x291   :  { %v608_v29 = vadd.f32 3.0, %v607_v42  ;;  %v961_v6 = vpop.f32.mrb[1].mxu1  ;;  %v1677_v42 = vld [vmem:[#allocation54_spill] sm:$0xff] }
 0x292   :  { %v1678_v6 = vld [vmem:[#allocation55_spill] sm:$0xff] }
 0x293   :  { %v611_v41 = vmax.f32 %v608_v29, 0.0 }
 0x295   :  { %v612_v40 = vmin.f32 %v611_v41, 6.0 }
 0x297   :  { %v613_v44 = vmul.f32 0.16666667, %v612_v40 }
 0x299   :  { %v617_v22 = vrot.slane %v613_v44, %v616_v16  ;;  %v684_v1 = vrot.slane %v613_v44, %v683_v62  ;;  %v1679_v44 = vld [vmem:[#allocation50_spill] sm:$0xff]  ;;  %v1680_v62 = vld [vmem:[#allocation51_spill] sm:$0xff] }
 0x29b   :  { %623 = vbcast.lane.b32.xlu1 %v617_v22, 264  ;;  %619 = vbcast.lane.b32.xlu0 %v617_v22, 256 }
 0x29f   :  { %627 = vbcast.lane.b32.xlu1 %v617_v22, 272  ;;  %635 = vbcast.lane.b32.xlu0 %v617_v22, 288 }
 0x2a3   :  { %631 = vbcast.lane.b32.xlu1 %v617_v22, 280  ;;  %643 = vbcast.lane.b32.xlu0 %v617_v22, 304 }
 0x2a7   :  { %639 = vbcast.lane.b32.xlu1 %v617_v22, 296  ;;  %651 = vbcast.lane.b32.xlu0 %v617_v22, 320 }
 0x2ab   :  { %647 = vbcast.lane.b32.xlu1 %v617_v22, 312  ;;  %659 = vbcast.lane.b32.xlu0 %v617_v22, 336 }
 0x2af   :  { %655 = vbcast.lane.b32.xlu1 %v617_v22, 328  ;;  %667 = vbcast.lane.b32.xlu0 %v617_v22, 352 }
 0x2b3   :  { %663 = vbcast.lane.b32.xlu1 %v617_v22, 344  ;;  %675 = vbcast.lane.b32.xlu0 %v617_v22, 368 }
 0x2b7   :  { %671 = vbcast.lane.b32.xlu1 %v617_v22, 360  ;;  %686 = vbcast.lane.b32.xlu0 %v684_v1, 256 }
 0x2bb   :  { %679 = vbcast.lane.b32.xlu1 %v617_v22, 376  ;;  %694 = vbcast.lane.b32.xlu0 %v684_v1, 272 }
 0x2bf   :  { %690 = vbcast.lane.b32.xlu1 %v684_v1, 264  ;;  %702 = vbcast.lane.b32.xlu0 %v684_v1, 288 }
 0x2c3   :  { %698 = vbcast.lane.b32.xlu1 %v684_v1, 280  ;;  %710 = vbcast.lane.b32.xlu0 %v684_v1, 304 }
 0x2c7   :  { %706 = vbcast.lane.b32.xlu1 %v684_v1, 296  ;;  %718 = vbcast.lane.b32.xlu0 %v684_v1, 320 }
 0x2cb   :  { %714 = vbcast.lane.b32.xlu1 %v684_v1, 312  ;;  %726 = vbcast.lane.b32.xlu0 %v684_v1, 336 }
 0x2cf   :  { %722 = vbcast.lane.b32.xlu1 %v684_v1, 328  ;;  %734 = vbcast.lane.b32.xlu0 %v684_v1, 352 }
 0x2d3   :  { %730 = vbcast.lane.b32.xlu1 %v684_v1, 344  ;;  %742 = vbcast.lane.b32.xlu0 %v684_v1, 368 }
 0x2d7   :  { %738 = vbcast.lane.b32.xlu1 %v684_v1, 360 }
 0x2db   :  { %746 = vbcast.lane.b32.xlu1 %v684_v1, 376 }
 0x30d   :  { %v624_v31 = vpop.permute.xlu1 %623  ;;  %v620_v49 = vpop.permute.xlu0 %619 }
 0x30e   :  { %v750_v43 = vmul.f32 %v624_v31, %v1105_v8  ;;  %v751_v13 = vmul.f32 %v624_v31, %v1107_v9  ;;  %v748_v19 = vmul.f32 %v620_v49, %v1093_v2  ;;  %v749_v51 = vmul.f32 %v620_v49, %v1097_v4  ;;  %v1681_v31 = vld [vmem:[#allocation8_spill] sm:$0xff] }
 0x310   :  { %814 = vst [vmem:[#allocation5 + $0x10] sm:$0xff] %v750_v43  ;;  %815 = vst [vmem:[#allocation5 + $0x18] sm:$0xff] %v751_v13  ;;  %v1682_v43 = vld [vmem:[#allocation9_spill] sm:$0xff] }
 0x311   :  { %812 = vst [vmem:[#allocation5] sm:$0xff] %v748_v19  ;;  %813 = vst [vmem:[#allocation5 + $0x8] sm:$0xff] %v749_v51  ;;  %v628_v50 = vpop.permute.xlu1 %627  ;;  %v636_v48 = vpop.permute.xlu0 %635 }
 0x312   :  { %v752_v52 = vmul.f32 %v628_v50, %v1117_v14  ;;  %v753_v18 = vmul.f32 %v628_v50, %v1119_v15  ;;  %v756_v28 = vmul.f32 %v636_v48, %v1141_v26  ;;  %v757_v8 = vmul.f32 %v636_v48, %v1143_v27  ;;  %v1663_v27 = vld [vmem:[#allocation20_spill] sm:$0xff]  ;;  %v1683_v50 = vld [vmem:[#allocation58_spill] sm:$0xff] }
 0x314   :  { %816 = vst [vmem:[#allocation5 + $0x20] sm:$0xff] %v752_v52  ;;  %817 = vst [vmem:[#allocation5 + $0x28] sm:$0xff] %v753_v18  ;;  %v1684_v52 = vld [vmem:[#allocation59_spill] sm:$0xff] }
 0x315   :  { %820 = vst [vmem:[#allocation5 + $0x40] sm:$0xff] %v756_v28  ;;  %821 = vst [vmem:[#allocation5 + $0x48] sm:$0xff] %v757_v8  ;;  %v632_v2 = vpop.permute.xlu1 %631  ;;  %v644_v4 = vpop.permute.xlu0 %643  ;;  %v1685_v28 = vld [vmem:[#allocation12_spill] sm:$0xff] }
 0x316   :  { %v754_v9 = vmul.f32 %v632_v2, %v1129_v20  ;;  %v755_v33 = vmul.f32 %v632_v2, %v1131_v21  ;;  %v760_v11 = vmul.f32 %v644_v4, %v1165_v38  ;;  %v761_v14 = vmul.f32 %v644_v4, %v1167_v39  ;;  %v1667_v39 = vld [vmem:[#allocation26_spill] sm:$0xff]  ;;  %v1686_v2 = vld [vmem:[#allocation13_spill] sm:$0xff] }
 0x318   :  { %818 = vst [vmem:[#allocation5 + $0x30] sm:$0xff] %v754_v9  ;;  %819 = vst [vmem:[#allocation5 + $0x38] sm:$0xff] %v755_v33 }
 0x319   :  { %824 = vst [vmem:[#allocation5 + $0x60] sm:$0xff] %v760_v11  ;;  %825 = vst [vmem:[#allocation5 + $0x68] sm:$0xff] %v761_v14  ;;  %v640_v15 = vpop.permute.xlu1 %639  ;;  %v652_v26 = vpop.permute.xlu0 %651  ;;  %v1687_v11 = vld [vmem:[#allocation10_spill] sm:$0xff] }
 0x31a   :  { %v758_v57 = vmul.f32 %v640_v15, %v1663_v27  ;;  %v759_v32 = vmul.f32 %v640_v15, %v1664_v24  ;;  %v764_v63 = vmul.f32 %v652_v26, %v1665_v5  ;;  %v765_v20 = vmul.f32 %v652_v26, %v1666_v30  ;;  %v1688_v15 = vld [vmem:[#allocation11_spill] sm:$0xff]  ;;  %v1689_v27 = vld [vmem:[#allocation16_spill] sm:$0xff]  ;;  %v1690_v24 = vld [vmem:[#allocation17_spill] sm:$0xff] }
 0x31b   :  { %v1691_v30 = vld [vmem:[#allocation14_spill] sm:$0xff] }
 0x31c   :  { %822 = vst [vmem:[#allocation5 + $0x50] sm:$0xff] %v758_v57  ;;  %823 = vst [vmem:[#allocation5 + $0x58] sm:$0xff] %v759_v32 }
 0x31d   :  { %828 = vst [vmem:[#allocation5 + $0x80] sm:$0xff] %v764_v63  ;;  %829 = vst [vmem:[#allocation5 + $0x88] sm:$0xff] %v765_v20  ;;  %v648_v21 = vpop.permute.xlu1 %647  ;;  %v660_v38 = vpop.permute.xlu0 %659 }
 0x31e   :  { %v762_v23 = vmul.f32 %v648_v21, %v1667_v39  ;;  %v763_v54 = vmul.f32 %v648_v21, %v1668_v46  ;;  %v768_v12 = vmul.f32 %v660_v38, %v1669_v47  ;;  %v769_v10 = vmul.f32 %v660_v38, %v1670_v3  ;;  %v1692_v21 = vld [vmem:[#allocation15_spill] sm:$0xff]  ;;  %v1693_v39 = vld [vmem:[#allocation22_spill] sm:$0xff] }
 0x31f   :  { %v1694_v46 = vld [vmem:[#allocation23_spill] sm:$0xff]  ;;  %v1695_v3 = vld [vmem:[#allocation18_spill] sm:$0xff] }
 0x320   :  { %826 = vst [vmem:[#allocation5 + $0x70] sm:$0xff] %v762_v23  ;;  %827 = vst [vmem:[#allocation5 + $0x78] sm:$0xff] %v763_v54 }
 0x321   :  { %832 = vst [vmem:[#allocation5 + $0xa0] sm:$0xff] %v768_v12  ;;  %833 = vst [vmem:[#allocation5 + $0xa8] sm:$0xff] %v769_v10  ;;  %v656_v53 = vpop.permute.xlu1 %655  ;;  %v668_v55 = vpop.permute.xlu0 %667 }
 0x322   :  { %v766_v7 = vmul.f32 %v656_v53, %v1671_v59  ;;  %v767_v17 = vmul.f32 %v656_v53, %v1672_v37  ;;  %v772_v61 = vmul.f32 %v668_v55, %v1673_v36  ;;  %v773_v35 = vmul.f32 %v668_v55, %v1674_v58  ;;  %v1696_v53 = vld [vmem:[#allocation19_spill] sm:$0xff]  ;;  %v1697_v59 = vld [vmem:[#allocation28_spill] sm:$0xff]  ;;  %v1698_v37 = vld [vmem:[#allocation29_spill] sm:$0xff] }
 0x323   :  { %v1699_v58 = vld [vmem:[#allocation24_spill] sm:$0xff] }
 0x324   :  { %830 = vst [vmem:[#allocation5 + $0x90] sm:$0xff] %v766_v7  ;;  %831 = vst [vmem:[#allocation5 + $0x98] sm:$0xff] %v767_v17 }
 0x325   :  { %836 = vst [vmem:[#allocation5 + $0xc0] sm:$0xff] %v772_v61  ;;  %837 = vst [vmem:[#allocation5 + $0xc8] sm:$0xff] %v773_v35  ;;  %v664_v34 = vpop.permute.xlu1 %663  ;;  %v676_v0 = vpop.permute.xlu0 %675 }
 0x326   :  { %v770_v45 = vmul.f32 %v664_v34, %v1675_v25  ;;  %v771_v56 = vmul.f32 %v664_v34, %v1676_v60  ;;  %v776_v29 = vmul.f32 %v676_v0, %v1677_v42  ;;  %v777_v41 = vmul.f32 %v676_v0, %v1678_v6  ;;  %v1700_v34 = vld [vmem:[#allocation25_spill] sm:$0xff]  ;;  %v1701_v25 = vld [vmem:[#allocation36_spill] sm:$0xff] }
 0x327   :  { %v1702_v60 = vld [vmem:[#allocation37_spill] sm:$0xff]  ;;  %v1703_v6 = vld [vmem:[#allocation32_spill] sm:$0xff] }
 0x328   :  { %834 = vst [vmem:[#allocation5 + $0xb0] sm:$0xff] %v770_v45  ;;  %835 = vst [vmem:[#allocation5 + $0xb8] sm:$0xff] %v771_v56 }
 0x329   :  { %840 = vst [vmem:[#allocation5 + $0xe0] sm:$0xff] %v776_v29  ;;  %841 = vst [vmem:[#allocation5 + $0xe8] sm:$0xff] %v777_v41  ;;  %v672_v40 = vpop.permute.xlu1 %671  ;;  %v687_v16 = vpop.permute.xlu0 %686 }
 0x32a   :  { %v774_v22 = vmul.f32 %v672_v40, %v1679_v44  ;;  %v775_v1 = vmul.f32 %v672_v40, %v1680_v62  ;;  %v780_v49 = vmul.f32 %v687_v16, %v1681_v31  ;;  %v781_v13 = vmul.f32 %v687_v16, %v1682_v43  ;;  %v1704_v40 = vld [vmem:[#allocation33_spill] sm:$0xff]  ;;  %v1705_v44 = vld [vmem:[#allocation44_spill] sm:$0xff] }
 0x32b   :  { %v1706_v62 = vld [vmem:[#allocation45_spill] sm:$0xff]  ;;  %v1707_v43 = vld [vmem:[#allocation40_spill] sm:$0xff] }
 0x32c   :  { %838 = vst [vmem:[#allocation5 + $0xd0] sm:$0xff] %v774_v22  ;;  %839 = vst [vmem:[#allocation5 + $0xd8] sm:$0xff] %v775_v1 }
 0x32d   :  { %844 = vst [vmem:[#allocation5 + $0x100] sm:$0xff] %v780_v49  ;;  %845 = vst [vmem:[#allocation5 + $0x108] sm:$0xff] %v781_v13  ;;  %v680_v19 = vpop.permute.xlu1 %679  ;;  %v695_v51 = vpop.permute.xlu0 %694 }
 0x32e   :  { %v778_v48 = vmul.f32 %v680_v19, %v1683_v50  ;;  %v779_v18 = vmul.f32 %v680_v19, %v1684_v52  ;;  %v784_v8 = vmul.f32 %v695_v51, %v1685_v28  ;;  %v785_v4 = vmul.f32 %v695_v51, %v1686_v2  ;;  %v1708_v19 = vld [vmem:[#allocation41_spill] sm:$0xff]  ;;  %v1709_v50 = vld [vmem:[#allocation52_spill] sm:$0xff] }
 0x32f   :  { %v1710_v52 = vld [vmem:[#allocation53_spill] sm:$0xff] }
 0x330   :  { %842 = vst [vmem:[#allocation5 + $0xf0] sm:$0xff] %v778_v48  ;;  %843 = vst [vmem:[#allocation5 + $0xf8] sm:$0xff] %v779_v18 }
 0x331   :  { %848 = vst [vmem:[#allocation5 + $0x120] sm:$0xff] %v784_v8  ;;  %849 = vst [vmem:[#allocation5 + $0x128] sm:$0xff] %v785_v4  ;;  %v691_v9 = vpop.permute.xlu1 %690  ;;  %v703_v33 = vpop.permute.xlu0 %702  ;;  %v1711_v8 = vld [vmem:[#allocation48_spill] sm:$0xff]  ;;  %v1712_v4 = vld [vmem:[#allocation49_spill] sm:$0xff] }
 0x332   :  { %v782_v14 = vmul.f32 %v691_v9, %v1687_v11  ;;  %v783_v26 = vmul.f32 %v691_v9, %v1688_v15  ;;  %v788_v57 = vmul.f32 %v703_v33, %v1689_v27  ;;  %v789_v32 = vmul.f32 %v703_v33, %v1690_v24  ;;  %v1713_v11 = vld [vmem:[#allocation56_spill] sm:$0xff]  ;;  %v1714_v15 = vld [vmem:[#allocation57_spill] sm:$0xff] }
 0x334   :  { %846 = vst [vmem:[#allocation5 + $0x110] sm:$0xff] %v782_v14  ;;  %847 = vst [vmem:[#allocation5 + $0x118] sm:$0xff] %v783_v26 }
 0x335   :  { %852 = vst [vmem:[#allocation5 + $0x140] sm:$0xff] %v788_v57  ;;  %853 = vst [vmem:[#allocation5 + $0x148] sm:$0xff] %v789_v32  ;;  %v699_v5 = vpop.permute.xlu1 %698  ;;  %v711_v63 = vpop.permute.xlu0 %710 }
 0x336   :  { %v786_v20 = vmul.f32 %v699_v5, %v1691_v30  ;;  %v787_v38 = vmul.f32 %v699_v5, %v1692_v21  ;;  %v792_v23 = vmul.f32 %v711_v63, %v1693_v39  ;;  %v793_v54 = vmul.f32 %v711_v63, %v1694_v46 }
 0x338   :  { %850 = vst [vmem:[#allocation5 + $0x130] sm:$0xff] %v786_v20  ;;  %851 = vst [vmem:[#allocation5 + $0x138] sm:$0xff] %v787_v38 }
 0x339   :  { %856 = vst [vmem:[#allocation5 + $0x160] sm:$0xff] %v792_v23  ;;  %857 = vst [vmem:[#allocation5 + $0x168] sm:$0xff] %v793_v54  ;;  %v707_v47 = vpop.permute.xlu1 %706  ;;  %v719_v12 = vpop.permute.xlu0 %718 }
 0x33a   :  { %v790_v10 = vmul.f32 %v707_v47, %v1695_v3  ;;  %v791_v55 = vmul.f32 %v707_v47, %v1696_v53  ;;  %v796_v7 = vmul.f32 %v719_v12, %v1697_v59  ;;  %v797_v17 = vmul.f32 %v719_v12, %v1698_v37 }
 0x33c   :  { %854 = vst [vmem:[#allocation5 + $0x150] sm:$0xff] %v790_v10  ;;  %855 = vst [vmem:[#allocation5 + $0x158] sm:$0xff] %v791_v55 }
 0x33d   :  { %860 = vst [vmem:[#allocation5 + $0x180] sm:$0xff] %v796_v7  ;;  %861 = vst [vmem:[#allocation5 + $0x188] sm:$0xff] %v797_v17  ;;  %v715_v36 = vpop.permute.xlu1 %714  ;;  %v727_v61 = vpop.permute.xlu0 %726 }
 0x33e   :  { %v794_v35 = vmul.f32 %v715_v36, %v1699_v58  ;;  %v795_v0 = vmul.f32 %v715_v36, %v1700_v34  ;;  %v800_v45 = vmul.f32 %v727_v61, %v1701_v25  ;;  %v801_v56 = vmul.f32 %v727_v61, %v1702_v60 }
 0x340   :  { %858 = vst [vmem:[#allocation5 + $0x170] sm:$0xff] %v794_v35  ;;  %859 = vst [vmem:[#allocation5 + $0x178] sm:$0xff] %v795_v0 }
 0x341   :  { %864 = vst [vmem:[#allocation5 + $0x1a0] sm:$0xff] %v800_v45  ;;  %865 = vst [vmem:[#allocation5 + $0x1a8] sm:$0xff] %v801_v56  ;;  %v723_v42 = vpop.permute.xlu1 %722  ;;  %v735_v29 = vpop.permute.xlu0 %734 }
 0x342   :  { %v798_v41 = vmul.f32 %v723_v42, %v1703_v6  ;;  %v799_v16 = vmul.f32 %v723_v42, %v1704_v40  ;;  %v804_v22 = vmul.f32 %v735_v29, %v1705_v44  ;;  %v805_v1 = vmul.f32 %v735_v29, %v1706_v62 }
 0x344   :  { %862 = vst [vmem:[#allocation5 + $0x190] sm:$0xff] %v798_v41  ;;  %863 = vst [vmem:[#allocation5 + $0x198] sm:$0xff] %v799_v16 }
 0x345   :  { %868 = vst [vmem:[#allocation5 + $0x1c0] sm:$0xff] %v804_v22  ;;  %869 = vst [vmem:[#allocation5 + $0x1c8] sm:$0xff] %v805_v1  ;;  %v731_v31 = vpop.permute.xlu1 %730  ;;  %v743_v49 = vpop.permute.xlu0 %742 }
 0x346   :  { %v802_v13 = vmul.f32 %v731_v31, %v1707_v43  ;;  %v803_v51 = vmul.f32 %v731_v31, %v1708_v19  ;;  %v808_v48 = vmul.f32 %v743_v49, %v1709_v50  ;;  %v809_v18 = vmul.f32 %v743_v49, %v1710_v52 }
 0x348   :  { %866 = vst [vmem:[#allocation5 + $0x1b0] sm:$0xff] %v802_v13  ;;  %867 = vst [vmem:[#allocation5 + $0x1b8] sm:$0xff] %v803_v51 }
 0x349   :  { %872 = vst [vmem:[#allocation5 + $0x1e0] sm:$0xff] %v808_v48  ;;  %873 = vst [vmem:[#allocation5 + $0x1e8] sm:$0xff] %v809_v18  ;;  %v739_v28 = vpop.permute.xlu1 %738 }
 0x34a   :  { %v806_v2 = vmul.f32 %v739_v28, %v1711_v8  ;;  %v807_v9 = vmul.f32 %v739_v28, %v1712_v4 }
 0x34c   :  { %870 = vst [vmem:[#allocation5 + $0x1d0] sm:$0xff] %v806_v2  ;;  %871 = vst [vmem:[#allocation5 + $0x1d8] sm:$0xff] %v807_v9 }
 0x34d   :  { %v747_v33 = vpop.permute.xlu1 %746 }
 0x34e   :  { %v810_v14 = vmul.f32 %v747_v33, %v1713_v11  ;;  %v811_v26 = vmul.f32 %v747_v33, %v1714_v15 }
 0x350   :  { %874 = vst [vmem:[#allocation5 + $0x1f0] sm:$0xff] %v810_v14  ;;  %875 = vst [vmem:[#allocation5 + $0x1f8] sm:$0xff] %v811_v26 }
 0x351   :  { %1032 = shalt.err (!%p1029_p12)
}
 0x352   :  { %s1033_s15 = scalar_lea.hbm %s1558_s3, 8192 }
 0x353   :  { %p1034_p13 = scmp.ne.s32.totalorder %s1558_s3, %s1033_s15  ;;  %p1037_p0 = scmp.lt.u32.totalorder %s1033_s15, %s1558_s3 }
 0x355   :  { %p1039_p1 = pnand %p1037_p0, %p1034_p13 }
 0x357   :  { %1042 = shalt.err (!%p1039_p1)
}
 0x358   :  { %887 = dma.vmem_to_hbm [thread:$0]  %s882_s11, 8192, %s1558_s3, [#allocation4], %s1048_s22, %s1048_s22, %s1049_s23  }
 0x359   :  { %1045 = dma.done.wait [#allocation4], 8192  }
 0x35a   :  { %1046 = vsyncadd [#allocation4], 4294959104 }
 0x35b   :  { %891 = vsyncpa [#allocation3], 1 }
 0x35c   :  { %892 = vsyncpa [#allocation4], 1 }

</bundles_post_ra>
